<compile_context>
chip_gen: v5e
topology: v5e:2x2
jax: 0.10.0
libtpu: 0.0.40
codegen_flags: <defaults>
</compile_context>

<pallas_src>
import numpy as np
import jax
import jax.numpy as jnp
from jax.experimental import pallas as pl
from jax.experimental.pallas import tpu as pltpu


# 3x3 taps (dh, dw); t = (dh+1)*3 + (dw+1) matches the (kh, kw) weight order.
_TAPS = tuple((dh, dw) for dh in (-1, 0, 1) for dw in (-1, 0, 1))


def _round_up(x, m):
    return -(-x // m) * m


def _cdiv(a, b):
    return -(-a // b)


def _tap_masks(H, W, n_blk):
    """(9, n_blk*H*W) f32 validity masks implementing 'SAME' zero padding,
    tiled across the images folded into the lane dimension."""
    h = np.arange(H)[:, None]
    w = np.arange(W)[None, :]
    masks = np.zeros((9, H * W), np.float32)
    for t, (dh, dw) in enumerate(_TAPS):
        valid = (h + dh >= 0) & (h + dh < H) & (w + dw >= 0) & (w + dw < W)
        masks[t] = valid.reshape(-1).astype(np.float32)
    return np.tile(masks, (1, n_blk))


def _make_block_kernel(H, W, Cin_p, Cout_p, n_blk):
    HW = H * W
    L = n_blk * HW

    def _im2col(src, col_ref, C, masks):
        # Row block (t*C:(t+1)*C) of the im2col matrix = shifted + masked src.
        # C is a multiple of 8, so every store is 8-sublane aligned.
        for t, (dh, dw) in enumerate(_TAPS):
            if dh == 0 and dw == 0:
                # Center tap: zero shift, all-ones mask -> write directly.
                col_ref[t * C:(t + 1) * C, :] = src
            else:
                shift = (-(dh * W + dw)) % L
                col_ref[t * C:(t + 1) * C, :] = (
                    pltpu.roll(src, shift, axis=1) * masks[t:t + 1, :])

    def block_kernel(x_ref, w1_ref, b1_ref, w2_ref, b2_ref, masks_ref,
                     o_ref, col1_ref, col2_ref):
        # x_ref    : (n_blk, Cin_p, HW)   channels on sublanes, spatial on lanes
        # w1_ref   : (Cout_p, 9*Cin_p)    tap-major im2col weights for conv1
        # b1_ref   : (Cout_p, 1)
        # w2_ref   : (Cout_p, 9*Cout_p)
        # b2_ref   : (Cout_p, 1)
        # masks_ref: (9, L)               per-tap zero-padding validity masks
        # o_ref    : (n_blk, Cout_p, HW)  lane-dense flattened-NCHW output
        # col1_ref : (9*Cin_p,  L)        VMEM scratch: im2col matrix for conv1
        # col2_ref : (9*Cout_p, L)        VMEM scratch: im2col matrix for conv2
        masks = masks_ref[...]                                   # (9, L)

        # Fold the n_blk images of this grid step into the lane dimension.
        if n_blk == 1:
            x = x_ref[0].astype(jnp.float32)                     # (Cin_p, L)
        else:
            x = jnp.concatenate(
                [x_ref[k].astype(jnp.float32) for k in range(n_blk)], axis=1)

        # ---- conv1: im2col + one dense MXU matmul (K = 9*Cin_p) + bias + relu
        _im2col(x, col1_ref, Cin_p, masks)
        y = jnp.dot(w1_ref[...], col1_ref[...],
                    preferred_element_type=jnp.float32)          # (Cout_p, L)
        y = jnp.maximum(y + b1_ref[...], 0.0)

        # ---- conv2: im2col + one dense MXU matmul (K = 9*Cout_p) + bias + relu
        _im2col(y, col2_ref, Cout_p, masks)
        out = jnp.dot(w2_ref[...], col2_ref[...],
                      preferred_element_type=jnp.float32)        # (Cout_p, L)
        out = jnp.maximum(out + b2_ref[...], 0.0).astype(o_ref.dtype)

        # Unfold lanes back into per-image slabs (lane-dense, aligned stores).
        for k in range(n_blk):
            o_ref[k] = out[:, k * HW:(k + 1) * HW]

    return block_kernel


def block_forward(x_nchw, w1_oihw, b1, w2_oihw, b2):
    """PyTorch-semantics Block forward. x_nchw: (N, Cin, H, W) -> (N, Cout, H, W)."""
    N, Cin, H, W = x_nchw.shape
    Cout = w1_oihw.shape[0]
    HW = H * W
    Cin_p = _round_up(Cin, 8)      # sublane-aligned channel counts
    Cout_p = _round_up(Cout, 8)

    # ---- choose batch folding (images per grid step) -------------------------
    # One grid step per TensorCore: keep >= 2 steps on 2-TC chips (v7x),
    # collapse to a single step on 1-TC chips (v5e/v6e).  Cap the per-step
    # lane width so the im2col scratch stays comfortably within VMEM.
    try:
        kind = jax.devices()[0].device_kind.lower()
    except Exception:
        kind = ""
    n_steps_target = 2 if ("v7" in kind and N >= 2) else 1
    lane_cap = max(1, 4096 // HW)
    n_blk = max(1, min(_cdiv(N, n_steps_target), lane_cap))
    n_steps = _cdiv(N, n_blk)
    N_pad = n_steps * n_blk
    L = n_blk * HW

    # NCHW stays NCHW: only flatten spatial dims (free reshape; no transpose,
    # no HBM pre-pad pass -- SAME padding handled by roll+mask inside kernel).
    x = x_nchw.reshape(N, Cin, HW)
    if (N_pad - N) or (Cin_p - Cin):
        x = jnp.pad(x, ((0, N_pad - N), (0, Cin_p - Cin), (0, 0)))

    # OIHW -> (Cout_p, 9*C_p) tap-major im2col weight matrices (zero-padded
    # channels contribute nothing; tiny one-off host-side work).
    w1_p = jnp.zeros((Cout_p, Cin_p, 3, 3), x.dtype).at[:Cout, :Cin].set(w1_oihw)
    w2_p = jnp.zeros((Cout_p, Cout_p, 3, 3), x.dtype).at[:Cout, :Cout].set(w2_oihw)
    w1m = jnp.transpose(w1_p, (0, 2, 3, 1)).reshape(Cout_p, 9 * Cin_p)
    w2m = jnp.transpose(w2_p, (0, 2, 3, 1)).reshape(Cout_p, 9 * Cout_p)
    b1c = jnp.zeros((Cout_p, 1), x.dtype).at[:Cout, 0].set(b1)
    b2c = jnp.zeros((Cout_p, 1), x.dtype).at[:Cout, 0].set(b2)
    masks = jnp.asarray(_tap_masks(H, W, n_blk))

    flops = 2 * N_pad * HW * 9 * (Cin_p * Cout_p + Cout_p * Cout_p)
    bytes_accessed = 4 * (N_pad * Cin_p * HW + N_pad * Cout_p * HW
                          + w1m.size + w2m.size + b1c.size + b2c.size + masks.size)

    out_flat = pl.pallas_call(
        _make_block_kernel(H, W, Cin_p, Cout_p, n_blk),
        out_shape=jax.ShapeDtypeStruct((N_pad, Cout_p, HW), x_nchw.dtype),
        grid_spec=pltpu.PrefetchScalarGridSpec(
            num_scalar_prefetch=0,
            grid=(n_steps,),
            in_specs=[
                pl.BlockSpec((n_blk, Cin_p, HW), lambda s: (s, 0, 0)),
                pl.BlockSpec((Cout_p, 9 * Cin_p), lambda s: (0, 0)),
                pl.BlockSpec((Cout_p, 1), lambda s: (0, 0)),
                pl.BlockSpec((Cout_p, 9 * Cout_p), lambda s: (0, 0)),
                pl.BlockSpec((Cout_p, 1), lambda s: (0, 0)),
                pl.BlockSpec((9, L), lambda s: (0, 0)),
            ],
            out_specs=pl.BlockSpec((n_blk, Cout_p, HW), lambda s: (s, 0, 0)),
            scratch_shapes=[
                pltpu.VMEM((9 * Cin_p, L), jnp.float32),
                pltpu.VMEM((9 * Cout_p, L), jnp.float32),
            ],
        ),
        compiler_params=pltpu.CompilerParams(
            dimension_semantics=("parallel",)),
        cost_estimate=pl.CostEstimate(
            flops=flops, transcendentals=0, bytes_accessed=bytes_accessed),
    )(x, w1m, b1c, w2m, b2c, masks)

    # Free reshape + slice back to (N, Cout, H, W) -- no transpose needed.
    return out_flat[:N, :Cout].reshape(N, Cout, H, W)


def _reference(x, w1, b1, w2, b2):
    dn = ("NCHW", "OIHW", "NCHW")
    y = jax.lax.conv_general_dilated(x, w1, (1, 1), "SAME", dimension_numbers=dn)
    y = jnp.maximum(y + b1[None, :, None, None], 0.0)
    y = jax.lax.conv_general_dilated(y, w2, (1, 1), "SAME", dimension_numbers=dn)
    return jnp.maximum(y + b2[None, :, None, None], 0.0)


if __name__ == "__main__":
    N, Cin, Cout, H, W = 2, 4, 8, 16, 16

    key = jax.random.PRNGKey(0)
    k_x, k_w1, k_b1, k_w2, k_b2 = jax.random.split(key, 5)

    x = jax.random.normal(k_x, (N, Cin, H, W), jnp.float32)

    # Deterministic init mimicking nn.Conv2d default (uniform +/- 1/sqrt(fan_in)).
    bound1 = 1.0 / np.sqrt(Cin * 3 * 3)
    w1 = jax.random.uniform(k_w1, (Cout, Cin, 3, 3), jnp.float32, -bound1, bound1)
    b1 = jax.random.uniform(k_b1, (Cout,), jnp.float32, -bound1, bound1)
    bound2 = 1.0 / np.sqrt(Cout * 3 * 3)
    w2 = jax.random.uniform(k_w2, (Cout, Cout, 3, 3), jnp.float32, -bound2, bound2)
    b2 = jax.random.uniform(k_b2, (Cout,), jnp.float32, -bound2, bound2)

    out = jax.block_until_ready(block_forward(x, w1, b1, w2, b2))

    ref = _reference(x, w1, b1, w2, b2)
    assert out.shape == (N, Cout, H, W)
    assert np.allclose(np.asarray(out), np.asarray(ref), atol=1e-4, rtol=1e-4)

    print("KERNEL_OK")
</pallas_src>

<mosaic_0001>
module attributes {stable_mosaic.version = 11 : i64} {
  func.func @block_kernel(%arg0: i32, %arg1: memref<2x8x256xf32, #tpu.memory_space<vmem>>, %arg2: memref<8x72xf32, #tpu.memory_space<vmem>>, %arg3: memref<8x1xf32, #tpu.memory_space<vmem>>, %arg4: memref<8x72xf32, #tpu.memory_space<vmem>>, %arg5: memref<8x1xf32, #tpu.memory_space<vmem>>, %arg6: memref<9x512xf32, #tpu.memory_space<vmem>>, %arg7: memref<2x8x256xf32, #tpu.memory_space<vmem>>, %arg8: memref<72x512xf32, #tpu.memory_space<vmem>>, %arg9: memref<72x512xf32, #tpu.memory_space<vmem>>) attributes {dimension_semantics = [#tpu.dimension_semantics<parallel>], iteration_bounds = array<i64: 1>, scalar_prefetch = 0 : i64, scratch_operands = 2 : i64, tpu.core_type = #tpu.core_type<tc>, window_params = [{transform_indices = @transform_0, window_bounds = array<i64: 2, 8, 256>}, {pipeline_mode = #tpu.pipeline_mode<synchronous>, transform_indices = @transform_1, window_bounds = array<i64: 8, 72>}, {pipeline_mode = #tpu.pipeline_mode<synchronous>, transform_indices = @transform_2, window_bounds = array<i64: 8, 1>}, {pipeline_mode = #tpu.pipeline_mode<synchronous>, transform_indices = @transform_3, window_bounds = array<i64: 8, 72>}, {pipeline_mode = #tpu.pipeline_mode<synchronous>, transform_indices = @transform_4, window_bounds = array<i64: 8, 1>}, {pipeline_mode = #tpu.pipeline_mode<synchronous>, transform_indices = @transform_5, window_bounds = array<i64: 9, 512>}, {transform_indices = @transform_6, window_bounds = array<i64: 2, 8, 256>}]} {
    %c0 = arith.constant 0 : index
    %c0_0 = arith.constant 0 : index
    %0 = vector.load %arg6[%c0, %c0_0] : memref<9x512xf32, #tpu.memory_space<vmem>>, vector<9x512xf32>
    %c0_1 = arith.constant 0 : index
    %c0_2 = arith.constant 0 : index
    %c0_3 = arith.constant 0 : index
    %1 = vector.load %arg1[%c0_1, %c0_2, %c0_3] : memref<2x8x256xf32, #tpu.memory_space<vmem>>, vector<1x8x256xf32>
    %2 = vector.shape_cast %1 : vector<1x8x256xf32> to vector<8x256xf32>
    %c1 = arith.constant 1 : index
    %c0_4 = arith.constant 0 : index
    %c0_5 = arith.constant 0 : index
    %3 = vector.load %arg1[%c1, %c0_4, %c0_5] : memref<2x8x256xf32, #tpu.memory_space<vmem>>, vector<1x8x256xf32>
    %4 = vector.shape_cast %3 : vector<1x8x256xf32> to vector<8x256xf32>
    %5 = tpu.concatenate %2, %4 in 1 : vector<8x256xf32>, vector<8x256xf32> -> vector<8x512xf32>
    %c17_i32 = arith.constant 17 : i32
    %6 = tpu.dynamic_rotate %5 by %c17_i32 dim 1 : vector<8x512xf32>, i32 -> vector<8x512xf32>
    %7 = vector.extract_strided_slice %0 {offsets = [0, 0], sizes = [1, 512], strides = [1, 1]} : vector<9x512xf32> to vector<1x512xf32>
    %8 = vector.broadcast %7 : vector<1x512xf32> to vector<8x512xf32>
    %9 = arith.mulf %6, %8 : vector<8x512xf32>
    %c0_6 = arith.constant 0 : index
    %c0_7 = arith.constant 0 : index
    %10 = vector.load %arg8[%c0_6, %c0_7] : memref<72x512xf32, #tpu.memory_space<vmem>>, vector<8x512xf32>
    tpu.vector_store %arg8[%c0_6, %c0_7], %9 {strides = array<i32>} : memref<72x512xf32, #tpu.memory_space<vmem>>, vector<8x512xf32>,
    %c16_i32 = arith.constant 16 : i32
    %11 = tpu.dynamic_rotate %5 by %c16_i32 dim 1 : vector<8x512xf32>, i32 -> vector<8x512xf32>
    %12 = vector.extract_strided_slice %0 {offsets = [1, 0], sizes = [1, 512], strides = [1, 1]} : vector<9x512xf32> to vector<1x512xf32>
    %13 = vector.broadcast %12 : vector<1x512xf32> to vector<8x512xf32>
    %14 = arith.mulf %11, %13 : vector<8x512xf32>
    %c8 = arith.constant 8 : index
    %c0_8 = arith.constant 0 : index
    %15 = vector.load %arg8[%c8, %c0_8] : memref<72x512xf32, #tpu.memory_space<vmem>>, vector<8x512xf32>
    tpu.vector_store %arg8[%c8, %c0_8], %14 {strides = array<i32>} : memref<72x512xf32, #tpu.memory_space<vmem>>, vector<8x512xf32>,
    %c15_i32 = arith.constant 15 : i32
    %16 = tpu.dynamic_rotate %5 by %c15_i32 dim 1 : vector<8x512xf32>, i32 -> vector<8x512xf32>
    %17 = vector.extract_strided_slice %0 {offsets = [2, 0], sizes = [1, 512], strides = [1, 1]} : vector<9x512xf32> to vector<1x512xf32>
    %18 = vector.broadcast %17 : vector<1x512xf32> to vector<8x512xf32>
    %19 = arith.mulf %16, %18 : vector<8x512xf32>
    %c16 = arith.constant 16 : index
    %c0_9 = arith.constant 0 : index
    %20 = vector.load %arg8[%c16, %c0_9] : memref<72x512xf32, #tpu.memory_space<vmem>>, vector<8x512xf32>
    tpu.vector_store %arg8[%c16, %c0_9], %19 {strides = array<i32>} : memref<72x512xf32, #tpu.memory_space<vmem>>, vector<8x512xf32>,
    %c1_i32 = arith.constant 1 : i32
    %21 = tpu.dynamic_rotate %5 by %c1_i32 dim 1 : vector<8x512xf32>, i32 -> vector<8x512xf32>
    %22 = vector.extract_strided_slice %0 {offsets = [3, 0], sizes = [1, 512], strides = [1, 1]} : vector<9x512xf32> to vector<1x512xf32>
    %23 = vector.broadcast %22 : vector<1x512xf32> to vector<8x512xf32>
    %24 = arith.mulf %21, %23 : vector<8x512xf32>
    %c24 = arith.constant 24 : index
    %c0_10 = arith.constant 0 : index
    %25 = vector.load %arg8[%c24, %c0_10] : memref<72x512xf32, #tpu.memory_space<vmem>>, vector<8x512xf32>
    tpu.vector_store %arg8[%c24, %c0_10], %24 {strides = array<i32>} : memref<72x512xf32, #tpu.memory_space<vmem>>, vector<8x512xf32>,
    %c32 = arith.constant 32 : index
    %c0_11 = arith.constant 0 : index
    %26 = vector.load %arg8[%c32, %c0_11] : memref<72x512xf32, #tpu.memory_space<vmem>>, vector<8x512xf32>
    tpu.vector_store %arg8[%c32, %c0_11], %5 {strides = array<i32>} : memref<72x512xf32, #tpu.memory_space<vmem>>, vector<8x512xf32>,
    %c511_i32 = arith.constant 511 : i32
    %27 = tpu.dynamic_rotate %5 by %c511_i32 dim 1 : vector<8x512xf32>, i32 -> vector<8x512xf32>
    %28 = vector.extract_strided_slice %0 {offsets = [5, 0], sizes = [1, 512], strides = [1, 1]} : vector<9x512xf32> to vector<1x512xf32>
    %29 = vector.broadcast %28 : vector<1x512xf32> to vector<8x512xf32>
    %30 = arith.mulf %27, %29 : vector<8x512xf32>
    %c40 = arith.constant 40 : index
    %c0_12 = arith.constant 0 : index
    %31 = vector.load %arg8[%c40, %c0_12] : memref<72x512xf32, #tpu.memory_space<vmem>>, vector<8x512xf32>
    tpu.vector_store %arg8[%c40, %c0_12], %30 {strides = array<i32>} : memref<72x512xf32, #tpu.memory_space<vmem>>, vector<8x512xf32>,
    %c497_i32 = arith.constant 497 : i32
    %32 = tpu.dynamic_rotate %5 by %c497_i32 dim 1 : vector<8x512xf32>, i32 -> vector<8x512xf32>
    %33 = vector.extract_strided_slice %0 {offsets = [6, 0], sizes = [1, 512], strides = [1, 1]} : vector<9x512xf32> to vector<1x512xf32>
    %34 = vector.broadcast %33 : vector<1x512xf32> to vector<8x512xf32>
    %35 = arith.mulf %32, %34 : vector<8x512xf32>
    %c48 = arith.constant 48 : index
    %c0_13 = arith.constant 0 : index
    %36 = vector.load %arg8[%c48, %c0_13] : memref<72x512xf32, #tpu.memory_space<vmem>>, vector<8x512xf32>
    tpu.vector_store %arg8[%c48, %c0_13], %35 {strides = array<i32>} : memref<72x512xf32, #tpu.memory_space<vmem>>, vector<8x512xf32>,
    %c496_i32 = arith.constant 496 : i32
    %37 = tpu.dynamic_rotate %5 by %c496_i32 dim 1 : vector<8x512xf32>, i32 -> vector<8x512xf32>
    %38 = vector.extract_strided_slice %0 {offsets = [7, 0], sizes = [1, 512], strides = [1, 1]} : vector<9x512xf32> to vector<1x512xf32>
    %39 = vector.broadcast %38 : vector<1x512xf32> to vector<8x512xf32>
    %40 = arith.mulf %37, %39 : vector<8x512xf32>
    %c56 = arith.constant 56 : index
    %c0_14 = arith.constant 0 : index
    %41 = vector.load %arg8[%c56, %c0_14] : memref<72x512xf32, #tpu.memory_space<vmem>>, vector<8x512xf32>
    tpu.vector_store %arg8[%c56, %c0_14], %40 {strides = array<i32>} : memref<72x512xf32, #tpu.memory_space<vmem>>, vector<8x512xf32>,
    %c495_i32 = arith.constant 495 : i32
    %42 = tpu.dynamic_rotate %5 by %c495_i32 dim 1 : vector<8x512xf32>, i32 -> vector<8x512xf32>
    %43 = vector.extract_strided_slice %0 {offsets = [8, 0], sizes = [1, 512], strides = [1, 1]} : vector<9x512xf32> to vector<1x512xf32>
    %44 = vector.broadcast %43 : vector<1x512xf32> to vector<8x512xf32>
    %45 = arith.mulf %42, %44 : vector<8x512xf32>
    %c64 = arith.constant 64 : index
    %c0_15 = arith.constant 0 : index
    %46 = vector.load %arg8[%c64, %c0_15] : memref<72x512xf32, #tpu.memory_space<vmem>>, vector<8x512xf32>
    tpu.vector_store %arg8[%c64, %c0_15], %45 {strides = array<i32>} : memref<72x512xf32, #tpu.memory_space<vmem>>, vector<8x512xf32>,
    %c0_16 = arith.constant 0 : index
    %c0_17 = arith.constant 0 : index
    %47 = vector.load %arg2[%c0_16, %c0_17] : memref<8x72xf32, #tpu.memory_space<vmem>>, vector<8x72xf32>
    %c0_18 = arith.constant 0 : index
    %c0_19 = arith.constant 0 : index
    %48 = vector.load %arg8[%c0_18, %c0_19] : memref<72x512xf32, #tpu.memory_space<vmem>>, vector<72x512xf32>
    %cst = arith.constant dense<0.000000e+00> : vector<8x512xf32>
    %49 = tpu.matmul %47, %48, %cst {dimension_numbers = #tpu.dot_dimension_numbers<[1], [0], [0], [1], [0, 0, 1, 1], [], []>} : vector<8x72xf32>, vector<72x512xf32>, vector<8x512xf32> -> vector<8x512xf32>
    %c0_20 = arith.constant 0 : index
    %c0_21 = arith.constant 0 : index
    %50 = vector.load %arg3[%c0_20, %c0_21] : memref<8x1xf32, #tpu.memory_space<vmem>>, vector<8x1xf32>
    %51 = vector.broadcast %50 : vector<8x1xf32> to vector<8x512xf32>
    %52 = arith.addf %49, %51 : vector<8x512xf32>
    %cst_22 = arith.constant 0.000000e+00 : f32
    %53 = vector.broadcast %cst_22 : f32 to vector<8x512xf32>
    %54 = arith.maximumf %52, %53 : vector<8x512xf32>
    %c17_i32_23 = arith.constant 17 : i32
    %55 = tpu.dynamic_rotate %54 by %c17_i32_23 dim 1 : vector<8x512xf32>, i32 -> vector<8x512xf32>
    %56 = vector.extract_strided_slice %0 {offsets = [0, 0], sizes = [1, 512], strides = [1, 1]} : vector<9x512xf32> to vector<1x512xf32>
    %57 = vector.broadcast %56 : vector<1x512xf32> to vector<8x512xf32>
    %58 = arith.mulf %55, %57 : vector<8x512xf32>
    %c0_24 = arith.constant 0 : index
    %c0_25 = arith.constant 0 : index
    %59 = vector.load %arg9[%c0_24, %c0_25] : memref<72x512xf32, #tpu.memory_space<vmem>>, vector<8x512xf32>
    tpu.vector_store %arg9[%c0_24, %c0_25], %58 {strides = array<i32>} : memref<72x512xf32, #tpu.memory_space<vmem>>, vector<8x512xf32>,
    %c16_i32_26 = arith.constant 16 : i32
    %60 = tpu.dynamic_rotate %54 by %c16_i32_26 dim 1 : vector<8x512xf32>, i32 -> vector<8x512xf32>
    %61 = vector.extract_strided_slice %0 {offsets = [1, 0], sizes = [1, 512], strides = [1, 1]} : vector<9x512xf32> to vector<1x512xf32>
    %62 = vector.broadcast %61 : vector<1x512xf32> to vector<8x512xf32>
    %63 = arith.mulf %60, %62 : vector<8x512xf32>
    %c8_27 = arith.constant 8 : index
    %c0_28 = arith.constant 0 : index
    %64 = vector.load %arg9[%c8_27, %c0_28] : memref<72x512xf32, #tpu.memory_space<vmem>>, vector<8x512xf32>
    tpu.vector_store %arg9[%c8_27, %c0_28], %63 {strides = array<i32>} : memref<72x512xf32, #tpu.memory_space<vmem>>, vector<8x512xf32>,
    %c15_i32_29 = arith.constant 15 : i32
    %65 = tpu.dynamic_rotate %54 by %c15_i32_29 dim 1 : vector<8x512xf32>, i32 -> vector<8x512xf32>
    %66 = vector.extract_strided_slice %0 {offsets = [2, 0], sizes = [1, 512], strides = [1, 1]} : vector<9x512xf32> to vector<1x512xf32>
    %67 = vector.broadcast %66 : vector<1x512xf32> to vector<8x512xf32>
    %68 = arith.mulf %65, %67 : vector<8x512xf32>
    %c16_30 = arith.constant 16 : index
    %c0_31 = arith.constant 0 : index
    %69 = vector.load %arg9[%c16_30, %c0_31] : memref<72x512xf32, #tpu.memory_space<vmem>>, vector<8x512xf32>
    tpu.vector_store %arg9[%c16_30, %c0_31], %68 {strides = array<i32>} : memref<72x512xf32, #tpu.memory_space<vmem>>, vector<8x512xf32>,
    %c1_i32_32 = arith.constant 1 : i32
    %70 = tpu.dynamic_rotate %54 by %c1_i32_32 dim 1 : vector<8x512xf32>, i32 -> vector<8x512xf32>
    %71 = vector.extract_strided_slice %0 {offsets = [3, 0], sizes = [1, 512], strides = [1, 1]} : vector<9x512xf32> to vector<1x512xf32>
    %72 = vector.broadcast %71 : vector<1x512xf32> to vector<8x512xf32>
    %73 = arith.mulf %70, %72 : vector<8x512xf32>
    %c24_33 = arith.constant 24 : index
    %c0_34 = arith.constant 0 : index
    %74 = vector.load %arg9[%c24_33, %c0_34] : memref<72x512xf32, #tpu.memory_space<vmem>>, vector<8x512xf32>
    tpu.vector_store %arg9[%c24_33, %c0_34], %73 {strides = array<i32>} : memref<72x512xf32, #tpu.memory_space<vmem>>, vector<8x512xf32>,
    %c32_35 = arith.constant 32 : index
    %c0_36 = arith.constant 0 : index
    %75 = vector.load %arg9[%c32_35, %c0_36] : memref<72x512xf32, #tpu.memory_space<vmem>>, vector<8x512xf32>
    tpu.vector_store %arg9[%c32_35, %c0_36], %54 {strides = array<i32>} : memref<72x512xf32, #tpu.memory_space<vmem>>, vector<8x512xf32>,
    %c511_i32_37 = arith.constant 511 : i32
    %76 = tpu.dynamic_rotate %54 by %c511_i32_37 dim 1 : vector<8x512xf32>, i32 -> vector<8x512xf32>
    %77 = vector.extract_strided_slice %0 {offsets = [5, 0], sizes = [1, 512], strides = [1, 1]} : vector<9x512xf32> to vector<1x512xf32>
    %78 = vector.broadcast %77 : vector<1x512xf32> to vector<8x512xf32>
    %79 = arith.mulf %76, %78 : vector<8x512xf32>
    %c40_38 = arith.constant 40 : index
    %c0_39 = arith.constant 0 : index
    %80 = vector.load %arg9[%c40_38, %c0_39] : memref<72x512xf32, #tpu.memory_space<vmem>>, vector<8x512xf32>
    tpu.vector_store %arg9[%c40_38, %c0_39], %79 {strides = array<i32>} : memref<72x512xf32, #tpu.memory_space<vmem>>, vector<8x512xf32>,
    %c497_i32_40 = arith.constant 497 : i32
    %81 = tpu.dynamic_rotate %54 by %c497_i32_40 dim 1 : vector<8x512xf32>, i32 -> vector<8x512xf32>
    %82 = vector.extract_strided_slice %0 {offsets = [6, 0], sizes = [1, 512], strides = [1, 1]} : vector<9x512xf32> to vector<1x512xf32>
    %83 = vector.broadcast %82 : vector<1x512xf32> to vector<8x512xf32>
    %84 = arith.mulf %81, %83 : vector<8x512xf32>
    %c48_41 = arith.constant 48 : index
    %c0_42 = arith.constant 0 : index
    %85 = vector.load %arg9[%c48_41, %c0_42] : memref<72x512xf32, #tpu.memory_space<vmem>>, vector<8x512xf32>
    tpu.vector_store %arg9[%c48_41, %c0_42], %84 {strides = array<i32>} : memref<72x512xf32, #tpu.memory_space<vmem>>, vector<8x512xf32>,
    %c496_i32_43 = arith.constant 496 : i32
    %86 = tpu.dynamic_rotate %54 by %c496_i32_43 dim 1 : vector<8x512xf32>, i32 -> vector<8x512xf32>
    %87 = vector.extract_strided_slice %0 {offsets = [7, 0], sizes = [1, 512], strides = [1, 1]} : vector<9x512xf32> to vector<1x512xf32>
    %88 = vector.broadcast %87 : vector<1x512xf32> to vector<8x512xf32>
    %89 = arith.mulf %86, %88 : vector<8x512xf32>
    %c56_44 = arith.constant 56 : index
    %c0_45 = arith.constant 0 : index
    %90 = vector.load %arg9[%c56_44, %c0_45] : memref<72x512xf32, #tpu.memory_space<vmem>>, vector<8x512xf32>
    tpu.vector_store %arg9[%c56_44, %c0_45], %89 {strides = array<i32>} : memref<72x512xf32, #tpu.memory_space<vmem>>, vector<8x512xf32>,
    %c495_i32_46 = arith.constant 495 : i32
    %91 = tpu.dynamic_rotate %54 by %c495_i32_46 dim 1 : vector<8x512xf32>, i32 -> vector<8x512xf32>
    %92 = vector.extract_strided_slice %0 {offsets = [8, 0], sizes = [1, 512], strides = [1, 1]} : vector<9x512xf32> to vector<1x512xf32>
    %93 = vector.broadcast %92 : vector<1x512xf32> to vector<8x512xf32>
    %94 = arith.mulf %91, %93 : vector<8x512xf32>
    %c64_47 = arith.constant 64 : index
    %c0_48 = arith.constant 0 : index
    %95 = vector.load %arg9[%c64_47, %c0_48] : memref<72x512xf32, #tpu.memory_space<vmem>>, vector<8x512xf32>
    tpu.vector_store %arg9[%c64_47, %c0_48], %94 {strides = array<i32>} : memref<72x512xf32, #tpu.memory_space<vmem>>, vector<8x512xf32>,
    %c0_49 = arith.constant 0 : index
    %c0_50 = arith.constant 0 : index
    %96 = vector.load %arg4[%c0_49, %c0_50] : memref<8x72xf32, #tpu.memory_space<vmem>>, vector<8x72xf32>
    %c0_51 = arith.constant 0 : index
    %c0_52 = arith.constant 0 : index
    %97 = vector.load %arg9[%c0_51, %c0_52] : memref<72x512xf32, #tpu.memory_space<vmem>>, vector<72x512xf32>
    %cst_53 = arith.constant dense<0.000000e+00> : vector<8x512xf32>
    %98 = tpu.matmul %96, %97, %cst_53 {dimension_numbers = #tpu.dot_dimension_numbers<[1], [0], [0], [1], [0, 0, 1, 1], [], []>} : vector<8x72xf32>, vector<72x512xf32>, vector<8x512xf32> -> vector<8x512xf32>
    %c0_54 = arith.constant 0 : index
    %c0_55 = arith.constant 0 : index
    %99 = vector.load %arg5[%c0_54, %c0_55] : memref<8x1xf32, #tpu.memory_space<vmem>>, vector<8x1xf32>
    %100 = vector.broadcast %99 : vector<8x1xf32> to vector<8x512xf32>
    %101 = arith.addf %98, %100 : vector<8x512xf32>
    %cst_56 = arith.constant 0.000000e+00 : f32
    %102 = vector.broadcast %cst_56 : f32 to vector<8x512xf32>
    %103 = arith.maximumf %101, %102 : vector<8x512xf32>
    %104 = vector.extract_strided_slice %103 {offsets = [0, 0], sizes = [8, 256], strides = [1, 1]} : vector<8x512xf32> to vector<8x256xf32>
    %c0_57 = arith.constant 0 : index
    %c0_58 = arith.constant 0 : index
    %c0_59 = arith.constant 0 : index
    %105 = vector.load %arg7[%c0_57, %c0_58, %c0_59] : memref<2x8x256xf32, #tpu.memory_space<vmem>>, vector<1x8x256xf32>
    %106 = vector.shape_cast %105 : vector<1x8x256xf32> to vector<8x256xf32>
    %107 = vector.shape_cast %104 : vector<8x256xf32> to vector<1x8x256xf32>
    tpu.vector_store %arg7[%c0_57, %c0_58, %c0_59], %107 {strides = array<i32>} : memref<2x8x256xf32, #tpu.memory_space<vmem>>, vector<1x8x256xf32>,
    %108 = vector.extract_strided_slice %103 {offsets = [0, 256], sizes = [8, 256], strides = [1, 1]} : vector<8x512xf32> to vector<8x256xf32>
    %c1_60 = arith.constant 1 : index
    %c0_61 = arith.constant 0 : index
    %c0_62 = arith.constant 0 : index
    %109 = vector.load %arg7[%c1_60, %c0_61, %c0_62] : memref<2x8x256xf32, #tpu.memory_space<vmem>>, vector<1x8x256xf32>
    %110 = vector.shape_cast %109 : vector<1x8x256xf32> to vector<8x256xf32>
    %111 = vector.shape_cast %108 : vector<8x256xf32> to vector<1x8x256xf32>
    tpu.vector_store %arg7[%c1_60, %c0_61, %c0_62], %111 {strides = array<i32>} : memref<2x8x256xf32, #tpu.memory_space<vmem>>, vector<1x8x256xf32>,
    return
  }
  func.func @transform_0(%arg0: i32) -> (i32, i32, i32) {
    %c0_i32 = arith.constant 0 : i32
    %c0_i32_0 = arith.constant 0 : i32
    %c0_i32_1 = arith.constant 0 : i32
    return %arg0, %c0_i32, %c0_i32_0 : i32, i32, i32
  }
  func.func @transform_1(%arg0: i32) -> (i32, i32) {
    %c0_i32 = arith.constant 0 : i32
    %c0_i32_0 = arith.constant 0 : i32
    %c0_i32_1 = arith.constant 0 : i32
    return %c0_i32, %c0_i32_0 : i32, i32
  }
  func.func @transform_2(%arg0: i32) -> (i32, i32) {
    %c0_i32 = arith.constant 0 : i32
    %c0_i32_0 = arith.constant 0 : i32
    %c0_i32_1 = arith.constant 0 : i32
    return %c0_i32, %c0_i32_0 : i32, i32
  }
  func.func @transform_3(%arg0: i32) -> (i32, i32) {
    %c0_i32 = arith.constant 0 : i32
    %c0_i32_0 = arith.constant 0 : i32
    %c0_i32_1 = arith.constant 0 : i32
    return %c0_i32, %c0_i32_0 : i32, i32
  }
  func.func @transform_4(%arg0: i32) -> (i32, i32) {
    %c0_i32 = arith.constant 0 : i32
    %c0_i32_0 = arith.constant 0 : i32
    %c0_i32_1 = arith.constant 0 : i32
    return %c0_i32, %c0_i32_0 : i32, i32
  }
  func.func @transform_5(%arg0: i32) -> (i32, i32) {
    %c0_i32 = arith.constant 0 : i32
    %c0_i32_0 = arith.constant 0 : i32
    %c0_i32_1 = arith.constant 0 : i32
    return %c0_i32, %c0_i32_0 : i32, i32
  }
  func.func @transform_6(%arg0: i32) -> (i32, i32, i32) {
    %c0_i32 = arith.constant 0 : i32
    %c0_i32_0 = arith.constant 0 : i32
    %c0_i32_1 = arith.constant 0 : i32
    return %arg0, %c0_i32, %c0_i32_0 : i32, i32, i32
  }
}

</mosaic_0001>

<bundles_post_ra>
// kernel: tpu_custom_call.1
= control target key start
LH: loop header
LB: loop body
LE: loop exit
PB: predicated region body
PF: predicated region fallthrough
CT: control target
= control target key end

     0   :  { %11 = vsyncpa [#allocation5], 0  ;;  %s1400_s0 = inlined_call_operand.hbm [shape: f32[2,8,256], index: 0, kind: input, shape index: {}]   ;;  %s1401_s1 = inlined_call_operand.vmem [shape: f32[8,72], index: 1, kind: input, shape index: {}]   ;;  %s1402_s2 = inlined_call_operand.vmem [shape: f32[8,1], index: 2, kind: input, shape index: {}]   ;;  %s1403_s3 = inlined_call_operand.vmem [shape: f32[8,72], index: 3, kind: input, shape index: {}]   ;;  %s1404_s4 = inlined_call_operand.vmem [shape: f32[8,1], index: 4, kind: input, shape index: {}]   ;;  %s1405_s5 = inlined_call_operand.hbm [shape: f32[9,512], index: 5, kind: input, shape index: {}]   ;;  %s1406_s6 = inlined_call_operand.hbm [shape: f32[2,8,256], index: 6, kind: output, shape index: {}]  }
   0x1   :  { %12 = vsyncpa [#allocation8], 0 }
   0x2   :  { %13 = vsyncpa [#allocation6], 0  ;;  %s18_s23 = sshll.u32 %s1400_s0, 4  ;;  %s832_s24 = smov [#allocation4]   ;;  %s19_s23 = int_to_ptr.hbm [resolvable:$true] %s18_s23 }
   0x3   :  { %s20_s25 = sshll.u32 %s832_s24, 4  ;;  %s39_s28 = sshll.u32 %s1405_s5, 4  ;;  %s21_s25 = int_to_ptr.vmem [resolvable:$true] %s20_s25  ;;  %s40_s28 = int_to_ptr.hbm [resolvable:$true] %s39_s28 }
   0x4   :  { %s833_s29 = smov 256   ;;  %s834_s30 = smov 16  }
   0x5   :  { %26 = dma.hbm_to_vmem [thread:$0]  %s19_s23, 512, %s21_s25, [#allocation5], %s833_s29, %s833_s29, %s834_s30  }
   0x6   :  { %s835_s7 = smov [#allocation7]   ;;  %s836_s9 = smov 512  }
   0x7   :  { %s41_s8 = sshll.u32 %s835_s7, 4  ;;  %s837_s0 = smov 32   ;;  %s42_s8 = int_to_ptr.vmem [resolvable:$true] %s41_s8 }
   0x8   :  { %47 = dma.hbm_to_vmem [thread:$0]  %s40_s28, 1024, %s42_s8, [#allocation8], %s836_s9, %s836_s9, %s837_s0  }
   0x9   :  { %826 = dma.done.wait [#allocation5], 512  }
   0xa   :  { %827 = vsyncadd [#allocation5], 4294966784 }
   0xb   :  { %828 = dma.done.wait [#allocation8], 1024  }
   0xc   :  { %829 = vsyncadd [#allocation8], 4294966272  ;;  %v891_v0 = vld [vmem:[#allocation4 + $0x18] sm:$0xff]  ;;  %v893_v1 = vld [vmem:[#allocation4 + $0x10] sm:$0xff]  ;;  %s838_s5 = smov 111   ;;  %s839_s10 = smov 112   ;;  %v77_v6 = vlaneseq }
   0xd   :  { %v895_v2 = vld [vmem:[#allocation4] sm:$0xff]  ;;  %256 = vrot.lane.b32.xlu1 %v891_v0, %s838_s5  ;;  %229 = vrot.lane.b32.xlu2 %v893_v1, %s839_s10  ;;  %s840_s11 = smov 113   ;;  %s841_s12 = smov 127   ;;  %v921_v3 = vld [vmem:[#allocation4 + $0x8] sm:$0xff]  ;;  %v968_v8 = vld [vmem:[#allocation7 + $0x38] ss:$0 sm:$0xff] }
   0xe   :  { %250 = vrot.lane.b32.xlu0 %v895_v2, %s838_s5  ;;  %s842_s13 = smov 1   ;;  %s843_s14 = smov 15   ;;  %v965_v7 = vand.u32 127, %v77_v6  ;;  %v973_v14 = vld [vmem:[#allocation7 + $0x18] sm:$0xff]  ;;  %v975_v15 = vld [vmem:[#allocation7 + $0x10] sm:$0xff]  ;;  %v1030_v49 = vld [vmem:[#allocation7] sm:$0xff] }
   0xf   :  { %s844_s15 = smov 17   ;;  %v241_v16 = vperm.slane %v973_v14, 7  ;;  %v979_v17 = vld [vmem:[#allocation7 + $0x30] ss:$0 sm:$0xff]  ;;  %v240_v21 = vperm.slane %v975_v15, 7  ;;  %v215_v28 = vperm.slane %v975_v15, 6 }
  0x10   :  { %vm258_vm0 = vcmp.lt.s32.totalorder %v965_v7, 111  ;;  %vm233_vm1 = vcmp.lt.s32.totalorder %v965_v7, 112  ;;  %vm208_vm2 = vcmp.lt.s32.totalorder %v965_v7, 113  ;;  %v216_v29 = vperm.slane %v973_v14, 6  ;;  %v1025_v46 = vld [vmem:[#allocation7 + $0x20] ss:$0 sm:$0xff] }
  0x11   :  { %v190_v37 = vperm.slane %v975_v15, 5  ;;  %vm183_vm3 = vcmp.lt.s32.totalorder %v965_v7, 127  ;;  %v191_v38 = vperm.slane %v973_v14, 5  ;;  %v1027_v47 = vld [vmem:[#allocation7 + $0x28] ss:$0 sm:$0xff]  ;;  %v238_v52 = vperm.slane %v1030_v49, 7 }
  0x12   :  { %v1032_v50 = vld [vmem:[#allocation7 + $0x8] sm:$0xff]  ;;  %v213_v60 = vperm.slane %v1030_v49, 6  ;;  %vm154_vm4 = vcmp.lt.s32.totalorder %v965_v7, 1  ;;  %v161_v6 = vperm.slane %v975_v15, 3  ;;  %vm129_vm5 = vcmp.lt.s32.totalorder %v965_v7, 15  ;;  %s711_s24 = sshll.u32 %s1406_s6, 4  ;;  %s712_s24 = int_to_ptr.hbm [resolvable:$true] %s711_s24 }
  0x13   :  { %v239_v53 = vperm.slane %v1032_v50, 7  ;;  %v214_v61 = vperm.slane %v1032_v50, 6  ;;  %vm104_vm6 = vcmp.lt.s32.totalorder %v965_v7, 16  ;;  %vm79_vm7 = vcmp.lt.s32.totalorder %v965_v7, 17 }
  0x14   :  { %vm318_vm8 = vcmask 588800  }
  0x15   :  { %231 = vrot.lane.b32.xlu2 %v891_v0, %s839_s10  ;;  %225 = vrot.lane.b32.xlu1 %v895_v2, %s839_s10 }
  0x16   :  { %254 = vrot.lane.b32.xlu0 %v893_v1, %s838_s5 }
  0x1d   :  { %206 = vrot.lane.b32.xlu2 %v891_v0, %s840_s11  ;;  %204 = vrot.lane.b32.xlu1 %v893_v1, %s840_s11 }
  0x1e   :  { %200 = vrot.lane.b32.xlu0 %v895_v2, %s840_s11 }
  0x25   :  { %181 = vrot.lane.b32.xlu2 %v891_v0, %s841_s12  ;;  %179 = vrot.lane.b32.xlu1 %v893_v1, %s841_s12 }
  0x26   :  { %175 = vrot.lane.b32.xlu0 %v895_v2, %s841_s12 }
  0x2d   :  { %148 = vrot.lane.b32.xlu2 %v921_v3, %s842_s13  ;;  %227 = vrot.lane.b32.xlu1 %v921_v3, %s839_s10 }
  0x2e   :  { %252 = vrot.lane.b32.xlu0 %v921_v3, %s838_s5 }
  0x35   :  { %202 = vrot.lane.b32.xlu2 %v921_v3, %s840_s11  ;;  %152 = vrot.lane.b32.xlu1 %v891_v0, %s842_s13 }
  0x36   :  { %150 = vrot.lane.b32.xlu0 %v893_v1, %s842_s13 }
  0x3d   :  { %127 = vrot.lane.b32.xlu2 %v891_v0, %s843_s14  ;;  %125 = vrot.lane.b32.xlu1 %v893_v1, %s843_s14 }
  0x3e   :  { %123 = vrot.lane.b32.xlu0 %v921_v3, %s843_s14 }
  0x45   :  { %100 = vrot.lane.b32.xlu2 %v893_v1, %s834_s30  ;;  %98 = vrot.lane.b32.xlu1 %v921_v3, %s834_s30 }
  0x46   :  { %177 = vrot.lane.b32.xlu0 %v921_v3, %s841_s12 }
  0x4d   :  { %73 = vrot.lane.b32.xlu2 %v893_v1, %s844_s15  ;;  %71 = vrot.lane.b32.xlu1 %v921_v3, %s844_s15 }
  0x4e   :  { %102 = vrot.lane.b32.xlu0 %v891_v0, %s834_s30 }
  0x55   :  { %121 = vrot.lane.b32.xlu2 %v895_v2, %s843_s14  ;;  %146 = vrot.lane.b32.xlu1 %v895_v2, %s842_s13 }
  0x56   :  { %75 = vrot.lane.b32.xlu0 %v891_v0, %s844_s15 }
  0x5d   :  { %69 = vrot.lane.b32.xlu1 %v895_v2, %s844_s15 }
  0x5e   :  { %96 = vrot.lane.b32.xlu0 %v895_v2, %s834_s30 }
  0x67   :  { %v963_v4 = vpop.permute.xlu2 %229 }
  0x6f   :  { %v232_v5 = vpop.permute.xlu2 %231 }
  0x70   :  { %v234_v22 = vsel %vm233_vm1, %v963_v4, %v232_v5 }
  0x71   :  { %v244_v27 = vmul.f32 %v240_v21, %v234_v22  ;;  %v137_v22 = vperm.slane %v973_v14, 2 }
  0x77   :  { %v207_v9 = vpop.permute.xlu2 %206 }
  0x7f   :  { %v257_v10 = vpop.permute.xlu1 %256  ;;  %v182_v23 = vpop.permute.xlu2 %181 }
  0x80   :  { %v251_v11 = vpop.permute.xlu0 %250 }
  0x81   :  { %v262_v12 = vsel %vm258_vm0, %v257_v10, %v251_v11 }
  0x82   :  { %v270_v13 = vmul.f32 %v968_v8, %v262_v12 }
  0x84   :  { %389 = vmatpush.msra.mxu3 %v270_v13 }
  0x87   :  { %v226_v18 = vpop.permute.xlu1 %225  ;;  %v1005_v36 = vpop.permute.xlu2 %148 }
  0x88   :  { %v237_v19 = vsel %vm233_vm1, %v232_v5, %v226_v18  ;;  %v255_v20 = vpop.permute.xlu0 %254 }
  0x89   :  { %v259_v24 = vsel %vm258_vm0, %v255_v20, %v257_v10  ;;  %v245_v25 = vmul.f32 %v241_v16, %v237_v19 }
  0x8a   :  { %v269_v26 = vmul.f32 %v979_v17, %v259_v24 }
  0x8b   :  { %390 = vmatpush.msra.mxu3 %v245_v25 }
  0x8c   :  { %369 = vmatpush.msra.mxu2 %v269_v26 }
  0x8e   :  { %370 = vmatpush.msra.mxu2 %v244_v27 }
  0x8f   :  { %v205_v30 = vpop.permute.xlu1 %204  ;;  %v203_v45 = vpop.permute.xlu2 %202 }
  0x90   :  { %v209_v31 = vsel %vm208_vm2, %v205_v30, %v207_v9  ;;  %v201_v32 = vpop.permute.xlu0 %200  ;;  %v210_v62 = vsel %vm208_vm2, %v203_v45, %v205_v30 }
  0x91   :  { %v212_v33 = vsel %vm208_vm2, %v207_v9, %v201_v32  ;;  %v219_v34 = vmul.f32 %v215_v28, %v209_v31  ;;  %v211_v63 = vsel %vm208_vm2, %v201_v32, %v203_v45  ;;  %v218_v5 = vmul.f32 %v214_v61, %v210_v62 }
  0x92   :  { %v220_v35 = vmul.f32 %v216_v29, %v212_v33  ;;  %v162_v9 = vperm.slane %v973_v14, 3  ;;  %v111_v33 = vperm.slane %v975_v15, 1  ;;  %v845_v45 = vmov 0  }
  0x93   :  { %371 = vmatpush.msra.mxu2 %v219_v34  ;;  %v188_v34 = vperm.slane %v1030_v49, 5  ;;  %748 = vset.pattern.permute.xlu2 %v845_v45 }
  0x94   :  { %391 = vmatpush.msra.mxu3 %v220_v35  ;;  %v189_v35 = vperm.slane %v1032_v50, 5  ;;  %749 = vset.pattern.permute.xlu0 %v845_v45 }
  0x97   :  { %v1010_v39 = vpop.permute.xlu1 %179  ;;  %v1064_v10 = vpop.permute.xlu2 %127 }
  0x98   :  { %v184_v40 = vsel %vm183_vm3, %v1010_v39, %v182_v23  ;;  %v1015_v41 = vpop.permute.xlu0 %175 }
  0x99   :  { %v187_v42 = vsel %vm183_vm3, %v182_v23, %v1015_v41  ;;  %v194_v43 = vmul.f32 %v190_v37, %v184_v40  ;;  %v136_v23 = vperm.slane %v975_v15, 2 }
  0x9a   :  { %v195_v44 = vmul.f32 %v191_v38, %v187_v42  ;;  %v312_v42 = vld [vmem:[%s1402_s2] sm:$0xff] }
  0x9b   :  { %372 = vmatpush.msra.mxu2 %v194_v43  ;;  %315 = vperm.xlu2 %748, %v312_v42   ;;  %v109_v42 = vperm.slane %v1030_v49, 1 }
  0x9c   :  { %392 = vmatpush.msra.mxu3 %v195_v44 }
  0x9d   :  { %373 = vmatpush.msra.mxu2 %v893_v1 }
  0x9e   :  { %393 = vmatpush.msra.mxu3 %v891_v0 }
  0x9f   :  { %v228_v48 = vpop.permute.xlu1 %227  ;;  %v101_v27 = vpop.permute.xlu2 %100 }
  0xa0   :  { %v253_v51 = vpop.permute.xlu0 %252  ;;  %v235_v54 = vsel %vm233_vm1, %v228_v48, %v963_v4  ;;  %v236_v55 = vsel %vm233_vm1, %v226_v18, %v228_v48  ;;  %v217_v4 = vmul.f32 %v213_v60, %v211_v63 }
  0xa1   :  { %v261_v56 = vsel %vm258_vm0, %v251_v11, %v253_v51  ;;  %v260_v57 = vsel %vm258_vm0, %v253_v51, %v255_v20  ;;  %v242_v0 = vmul.f32 %v238_v52, %v236_v55  ;;  %v243_v1 = vmul.f32 %v239_v53, %v235_v54 }
  0xa2   :  { %v267_v58 = vmul.f32 %v1025_v46, %v261_v56  ;;  %v268_v59 = vmul.f32 %v1027_v47, %v260_v57 }
  0xa4   :  { %329 = vmatpush.msra.mxu0 %v267_v58  ;;  %349 = vmatpush.msra.mxu1 %v268_v59 }
  0xa6   :  { %330 = vmatpush.msra.mxu0 %v242_v0  ;;  %350 = vmatpush.msra.mxu1 %v243_v1  ;;  %v275_v1 = vld [vmem:[%s1401_s1] sm:$0xff] }
  0xa7   :  { %v1066_v11 = vpop.permute.xlu1 %152  ;;  %v74_v57 = vpop.permute.xlu2 %73 }
  0xa8   :  { %v151_v12 = vpop.permute.xlu0 %150  ;;  %331 = vmatpush.msra.mxu0 %v217_v4  ;;  %351 = vmatpush.msra.mxu1 %v218_v5  ;;  %v159_v4 = vperm.slane %v1030_v49, 3  ;;  %v160_v5 = vperm.slane %v1032_v50, 3 }
  0xa9   :  { %v155_v13 = vsel %vm154_vm4, %v151_v12, %v1066_v11  ;;  %v156_v18 = vsel %vm154_vm4, %v1005_v36, %v151_v12  ;;  %v87_v12 = vperm.slane %v973_v14, 0 }
  0xaa   :  { %v165_v19 = vmul.f32 %v161_v6, %v156_v18  ;;  %v166_v20 = vmul.f32 %v162_v9, %v155_v13  ;;  %v134_v18 = vperm.slane %v1030_v49, 2 }
  0xac   :  { %374 = vmatpush.msra.mxu2 %v165_v19  ;;  %394 = vmatpush.msra.mxu3 %v166_v20  ;;  %v135_v19 = vperm.slane %v1032_v50, 2 }
  0xaf   :  { %v126_v24 = vpop.permute.xlu1 %125 }
  0xb0   :  { %v130_v25 = vsel %vm129_vm5, %v126_v24, %v1064_v10  ;;  %v124_v26 = vpop.permute.xlu0 %123 }
  0xb1   :  { %v131_v30 = vsel %vm129_vm5, %v124_v26, %v126_v24  ;;  %v141_v31 = vmul.f32 %v137_v22, %v130_v25 }
  0xb2   :  { %v140_v32 = vmul.f32 %v136_v23, %v131_v30 }
  0xb3   :  { %395 = vmatpush.msra.mxu3 %v141_v31 }
  0xb4   :  { %375 = vmatpush.msra.mxu2 %v140_v32 }
  0xb7   :  { %v1094_v40 = vpop.permute.xlu1 %98 }
  0xb8   :  { %v106_v43 = vsel %vm104_vm6, %v1094_v40, %v101_v27  ;;  %v178_v44 = vpop.permute.xlu0 %177 }
  0xb9   :  { %v185_v48 = vsel %vm183_vm3, %v178_v44, %v1010_v39  ;;  %v186_v51 = vsel %vm183_vm3, %v1015_v41, %v178_v44  ;;  %v115_v54 = vmul.f32 %v111_v33, %v106_v43  ;;  %v86_v39 = vperm.slane %v975_v15, 0 }
  0xba   :  { %v192_v55 = vmul.f32 %v188_v34, %v186_v51  ;;  %v193_v56 = vmul.f32 %v189_v35, %v185_v48  ;;  %v112_v41 = vperm.slane %v973_v14, 1  ;;  %v110_v43 = vperm.slane %v1032_v50, 1 }
  0xbb   :  { %376 = vmatpush.msra.mxu2 %v115_v54  ;;  %v84_v48 = vperm.slane %v1030_v49, 0  ;;  %v85_v51 = vperm.slane %v1032_v50, 0 }
  0xbc   :  { %332 = vmatpush.msra.mxu0 %v192_v55  ;;  %352 = vmatpush.msra.mxu1 %v193_v56 }
  0xbe   :  { %333 = vmatpush.msra.mxu0 %v895_v2  ;;  %353 = vmatpush.msra.mxu1 %v921_v3  ;;  %v122_v3 = vpop.permute.xlu2 %121 }
  0xbf   :  { %v72_v58 = vpop.permute.xlu1 %71  ;;  %v133_v20 = vsel %vm129_vm5, %v1064_v10, %v122_v3  ;;  %v132_v24 = vsel %vm129_vm5, %v122_v3, %v124_v26 }
  0xc0   :  { %v81_v59 = vsel %vm79_vm7, %v72_v58, %v74_v57  ;;  %v103_v62 = vpop.permute.xlu0 %102 }
  0xc1   :  { %v105_v63 = vsel %vm104_vm6, %v101_v27, %v103_v62  ;;  %v90_v0 = vmul.f32 %v86_v39, %v81_v59 }
  0xc2   :  { %v116_v2 = vmul.f32 %v112_v41, %v105_v63 }
  0xc3   :  { %377 = vmatpush.msra.mxu2 %v90_v0 }
  0xc4   :  { %396 = vmatpush.msra.mxu3 %v116_v2  ;;  %727 = vmatmul.msk.f32.vlgmr.msra.gmra.mxu2 %vm318_vm8, %v275_v1 }
  0xc7   :  { %v147_v13 = vpop.permute.xlu1 %146 }
  0xc8   :  { %v157_v25 = vsel %vm154_vm4, %v147_v13, %v1005_v36  ;;  %v158_v27 = vsel %vm154_vm4, %v1066_v11, %v147_v13  ;;  %v76_v30 = vpop.permute.xlu0 %75  ;;  %v138_v36 = vmul.f32 %v134_v18, %v133_v20  ;;  %v139_v11 = vmul.f32 %v135_v19, %v132_v24 }
  0xc9   :  { %v80_v31 = vsel %vm79_vm7, %v74_v57, %v76_v30  ;;  %v163_v32 = vmul.f32 %v159_v4, %v158_v27  ;;  %v164_v10 = vmul.f32 %v160_v5, %v157_v25 }
  0xca   :  { %v91_v26 = vmul.f32 %v87_v12, %v80_v31 }
  0xcb   :  { %334 = vmatpush.msra.mxu0 %v163_v32  ;;  %354 = vmatpush.msra.mxu1 %v164_v10  ;;  %v607_v10 = vld [vmem:[%s1404_s4] sm:$0xff] }
  0xcc   :  { %397 = vmatpush.msra.mxu3 %v91_v26 }
  0xcd   :  { %335 = vmatpush.msra.mxu0 %v138_v36  ;;  %355 = vmatpush.msra.mxu1 %v139_v11 }
  0xce   :  { %728 = vmatmul.msk.f32.vlgmr.msra.gmra.mxu3 %vm318_vm8, %v275_v1 }
  0xcf   :  { %v70_v44 = vpop.permute.xlu1 %69 }
  0xd0   :  { %v97_v45 = vpop.permute.xlu0 %96  ;;  %v82_v54 = vsel %vm79_vm7, %v70_v44, %v72_v58  ;;  %v83_v55 = vsel %vm79_vm7, %v76_v30, %v70_v44 }
  0xd1   :  { %v107_v56 = vsel %vm104_vm6, %v97_v45, %v1094_v40  ;;  %v108_v57 = vsel %vm104_vm6, %v103_v62, %v97_v45  ;;  %v88_v58 = vmul.f32 %v84_v48, %v83_v55  ;;  %v89_v0 = vmul.f32 %v85_v51, %v82_v54 }
  0xd2   :  { %v113_v59 = vmul.f32 %v109_v42, %v108_v57  ;;  %v114_v63 = vmul.f32 %v110_v43, %v107_v56 }
  0xd4   :  { %336 = vmatpush.msra.mxu0 %v113_v59  ;;  %356 = vmatpush.msra.mxu1 %v114_v63 }
  0xd6   :  { %337 = vmatpush.msra.mxu0 %v88_v58  ;;  %357 = vmatpush.msra.mxu1 %v89_v0 }
  0xd7   :  { %725 = vmatmul.msk.f32.vlgmr.msra.gmra.mxu0 %vm318_vm8, %v275_v1  ;;  %726 = vmatmul.msk.f32.vlgmr.msra.gmra.mxu1 %vm318_vm8, %v275_v1 }
  0xf5   :  { %v316_v40 = vpop.permute.xlu2 %315 }
 0x147   :  { %v379_v30 = vpop.f32.mrf.mxu2 }
 0x148   :  { %v380_v31 = vadd.f32 %v379_v30, %v316_v40 }
 0x14a   :  { %v1204_v32 = vmax.f32 %v380_v31, 0.0 }
 0x151   :  { %v399_v25 = vpop.f32.mrf.mxu3 }
 0x152   :  { %v400_v1 = vadd.f32 %v399_v25, %v316_v40 }
 0x154   :  { %v339_v62 = vpop.f32.mrf.mxu0  ;;  %v359_v2 = vpop.f32.mrf.mxu1  ;;  %v405_v27 = vmax.f32 %v400_v1, 0.0 }
 0x155   :  { %v340_v3 = vadd.f32 %v339_v62, %v316_v40  ;;  %v360_v13 = vadd.f32 %v359_v2, %v316_v40 }
 0x157   :  { %v1183_v20 = vmax.f32 %v340_v3, 0.0  ;;  %v1185_v24 = vmax.f32 %v360_v13, 0.0 }
 0x159   :  { %468 = vrot.lane.b32.xlu2 %v1185_v24, %s842_s13  ;;  %532 = vrot.lane.b32.xlu1 %v1185_v24, %s839_s10 }
 0x15a   :  { %550 = vrot.lane.b32.xlu0 %v1183_v20, %s838_s5 }
 0x161   :  { %512 = vrot.lane.b32.xlu2 %v1185_v24, %s840_s11  ;;  %428 = vrot.lane.b32.xlu1 %v1185_v24, %s834_s30 }
 0x162   :  { %530 = vrot.lane.b32.xlu0 %v1183_v20, %s839_s10 }
 0x169   :  { %556 = vrot.lane.b32.xlu2 %v405_v27, %s838_s5  ;;  %408 = vrot.lane.b32.xlu1 %v1185_v24, %s844_s15 }
 0x16a   :  { %510 = vrot.lane.b32.xlu0 %v1183_v20, %s840_s11 }
 0x171   :  { %536 = vrot.lane.b32.xlu2 %v405_v27, %s839_s10  ;;  %554 = vrot.lane.b32.xlu1 %v1204_v32, %s838_s5 }
 0x172   :  { %490 = vrot.lane.b32.xlu0 %v1183_v20, %s841_s12 }
 0x179   :  { %516 = vrot.lane.b32.xlu2 %v405_v27, %s840_s11  ;;  %534 = vrot.lane.b32.xlu1 %v1204_v32, %s839_s10 }
 0x17a   :  { %552 = vrot.lane.b32.xlu0 %v1185_v24, %s838_s5 }
 0x181   :  { %496 = vrot.lane.b32.xlu2 %v405_v27, %s841_s12  ;;  %514 = vrot.lane.b32.xlu1 %v1204_v32, %s840_s11 }
 0x182   :  { %448 = vrot.lane.b32.xlu0 %v1185_v24, %s843_s14 }
 0x189   :  { %452 = vrot.lane.b32.xlu2 %v405_v27, %s843_s14  ;;  %494 = vrot.lane.b32.xlu1 %v1204_v32, %s841_s12 }
 0x18a   :  { %492 = vrot.lane.b32.xlu0 %v1185_v24, %s841_s12 }
 0x191   :  { %430 = vrot.lane.b32.xlu2 %v1204_v32, %s834_s30  ;;  %472 = vrot.lane.b32.xlu1 %v405_v27, %s842_s13 }
 0x192   :  { %470 = vrot.lane.b32.xlu0 %v1204_v32, %s842_s13 }
 0x199   :  { %410 = vrot.lane.b32.xlu2 %v1204_v32, %s844_s15  ;;  %450 = vrot.lane.b32.xlu1 %v1204_v32, %s843_s14 }
 0x19a   :  { %432 = vrot.lane.b32.xlu0 %v405_v27, %s834_s30 }
 0x1a1   :  { %446 = vrot.lane.b32.xlu2 %v1183_v20, %s843_s14  ;;  %466 = vrot.lane.b32.xlu1 %v1183_v20, %s842_s13 }
 0x1a2   :  { %412 = vrot.lane.b32.xlu0 %v405_v27, %s844_s15 }
 0x1a9   :  { %610 = vperm.xlu2 %748, %v607_v10   ;;  %406 = vrot.lane.b32.xlu1 %v1183_v20, %s844_s15 }
 0x1aa   :  { %426 = vrot.lane.b32.xlu0 %v1183_v20, %s834_s30 }
 0x1b3   :  { %v1248_v26 = vpop.permute.xlu2 %468 }
 0x1bb   :  { %v513_v36 = vpop.permute.xlu2 %512 }
 0x1c3   :  { %v557_v11 = vpop.permute.xlu2 %556 }
 0x1cb   :  { %v533_v44 = vpop.permute.xlu1 %532  ;;  %v537_v56 = vpop.permute.xlu2 %536 }
 0x1cc   :  { %v551_v45 = vpop.permute.xlu0 %550 }
 0x1cd   :  { %v561_v54 = vsel %vm258_vm0, %v557_v11, %v551_v45 }
 0x1ce   :  { %v565_v55 = vmul.f32 %v968_v8, %v561_v54 }
 0x1d0   :  { %683 = vmatpush.msrb.mxu3 %v565_v55 }
 0x1d3   :  { %v1253_v57 = vpop.permute.xlu1 %428  ;;  %v517_v0 = vpop.permute.xlu2 %516 }
 0x1d4   :  { %v531_v59 = vpop.permute.xlu0 %530 }
 0x1d5   :  { %v541_v63 = vsel %vm233_vm1, %v537_v56, %v531_v59 }
 0x1d6   :  { %v545_v58 = vmul.f32 %v541_v63, %v241_v16 }
 0x1d8   :  { %684 = vmatpush.msrb.mxu3 %v545_v58 }
 0x1db   :  { %v1259_v40 = vpop.permute.xlu1 %408  ;;  %v497_v13 = vpop.permute.xlu2 %496 }
 0x1dc   :  { %v511_v62 = vpop.permute.xlu0 %510 }
 0x1dd   :  { %v521_v2 = vsel %vm208_vm2, %v517_v0, %v511_v62 }
 0x1de   :  { %v525_v8 = vmul.f32 %v521_v2, %v216_v29  ;;  %v540_v29 = vsel %vm233_vm1, %v531_v59, %v533_v44 }
 0x1e0   :  { %685 = vmatpush.msrb.mxu3 %v525_v8 }
 0x1e3   :  { %v555_v3 = vpop.permute.xlu1 %554 }
 0x1e4   :  { %v558_v25 = vsel %vm258_vm0, %v555_v3, %v557_v11  ;;  %v491_v1 = vpop.permute.xlu0 %490 }
 0x1e5   :  { %v501_v16 = vsel %vm183_vm3, %v497_v13, %v491_v1  ;;  %v564_v30 = vmul.f32 %v979_v17, %v558_v25 }
 0x1e6   :  { %v505_v31 = vmul.f32 %v501_v16, %v191_v38 }
 0x1e7   :  { %663 = vmatpush.msrb.mxu2 %v564_v30 }
 0x1e8   :  { %686 = vmatpush.msrb.mxu3 %v505_v31 }
 0x1ea   :  { %687 = vmatpush.msrb.mxu3 %v405_v27 }
 0x1eb   :  { %v535_v10 = vpop.permute.xlu1 %534 }
 0x1ec   :  { %v538_v54 = vsel %vm233_vm1, %v535_v10, %v537_v56  ;;  %v553_v11 = vpop.permute.xlu0 %552  ;;  %v539_v55 = vsel %vm233_vm1, %v533_v44, %v535_v10  ;;  %v520_v56 = vsel %vm208_vm2, %v511_v62, %v513_v36  ;;  %v542_v44 = vmul.f32 %v540_v29, %v238_v52 }
 0x1ed   :  { %v559_v17 = vsel %vm258_vm0, %v553_v11, %v555_v3  ;;  %v560_v38 = vsel %vm258_vm0, %v551_v45, %v553_v11  ;;  %v544_v27 = vmul.f32 %v538_v54, %v240_v21  ;;  %v543_v58 = vmul.f32 %v539_v55, %v239_v53 }
 0x1ee   :  { %v562_v63 = vmul.f32 %v1025_v46, %v560_v38  ;;  %v563_v59 = vmul.f32 %v1027_v47, %v559_v17  ;;  %v522_v21 = vmul.f32 %v520_v56, %v213_v60  ;;  %v453_v46 = vpop.permute.xlu2 %452 }
 0x1ef   :  { %664 = vmatpush.msrb.mxu2 %v544_v27 }
 0x1f0   :  { %623 = vmatpush.msrb.mxu0 %v562_v63  ;;  %643 = vmatpush.msrb.mxu1 %v563_v59 }
 0x1f2   :  { %624 = vmatpush.msrb.mxu0 %v542_v44  ;;  %644 = vmatpush.msrb.mxu1 %v543_v58 }
 0x1f3   :  { %v515_v45 = vpop.permute.xlu1 %514 }
 0x1f4   :  { %v518_v47 = vsel %vm208_vm2, %v515_v45, %v517_v0  ;;  %v519_v62 = vsel %vm208_vm2, %v513_v36, %v515_v45  ;;  %625 = vmatpush.msrb.mxu0 %v522_v21  ;;  %v449_v2 = vpop.permute.xlu0 %448 }
 0x1f5   :  { %v523_v52 = vmul.f32 %v519_v62, %v214_v61  ;;  %v524_v53 = vmul.f32 %v518_v47, %v215_v28 }
 0x1f6   :  { %v431_v25 = vpop.permute.xlu2 %430 }
 0x1f7   :  { %645 = vmatpush.msrb.mxu1 %v523_v52  ;;  %665 = vmatpush.msrb.mxu2 %v524_v53 }
 0x1fb   :  { %v495_v8 = vpop.permute.xlu1 %494 }
 0x1fc   :  { %v498_v60 = vsel %vm183_vm3, %v495_v8, %v497_v13  ;;  %v493_v3 = vpop.permute.xlu0 %492 }
 0x1fd   :  { %v499_v0 = vsel %vm183_vm3, %v493_v3, %v495_v8  ;;  %v500_v36 = vsel %vm183_vm3, %v491_v1, %v493_v3  ;;  %v504_v61 = vmul.f32 %v498_v60, %v190_v37 }
 0x1fe   :  { %v502_v28 = vmul.f32 %v500_v36, %v188_v34  ;;  %v503_v16 = vmul.f32 %v499_v0, %v189_v35 }
 0x1ff   :  { %666 = vmatpush.msrb.mxu2 %v504_v61 }
 0x200   :  { %626 = vmatpush.msrb.mxu0 %v502_v28  ;;  %646 = vmatpush.msrb.mxu1 %v503_v16 }
 0x201   :  { %667 = vmatpush.msrb.mxu2 %v1204_v32  ;;  %v411_v32 = vpop.permute.xlu2 %410 }
 0x202   :  { %627 = vmatpush.msrb.mxu0 %v1183_v20  ;;  %647 = vmatpush.msrb.mxu1 %v1185_v24  ;;  %v435_v24 = vsel %vm104_vm6, %v1253_v57, %v431_v25  ;;  %v415_v11 = vsel %vm79_vm7, %v1259_v40, %v411_v32 }
 0x203   :  { %v473_v13 = vpop.permute.xlu1 %472  ;;  %v440_v55 = vmul.f32 %v435_v24, %v111_v33 }
 0x204   :  { %v471_v1 = vpop.permute.xlu0 %470 }
 0x205   :  { %v474_v37 = vsel %vm154_vm4, %v471_v1, %v473_v13  ;;  %v475_v34 = vsel %vm154_vm4, %v1248_v26, %v471_v1 }
 0x206   :  { %v480_v35 = vmul.f32 %v475_v34, %v161_v6  ;;  %v481_v30 = vmul.f32 %v474_v37, %v162_v9 }
 0x208   :  { %668 = vmatpush.msrb.mxu2 %v480_v35  ;;  %688 = vmatpush.msrb.mxu3 %v481_v30 }
 0x209   :  { %v447_v38 = vpop.permute.xlu2 %446 }
 0x20a   :  { %v457_v63 = vsel %vm129_vm5, %v453_v46, %v447_v38  ;;  %v456_v15 = vsel %vm129_vm5, %v447_v38, %v449_v2 }
 0x20b   :  { %v451_v20 = vpop.permute.xlu1 %450  ;;  %v458_v58 = vmul.f32 %v457_v63, %v134_v18  ;;  %v459_v21 = vmul.f32 %v456_v15, %v135_v19 }
 0x20c   :  { %v454_v31 = vsel %vm129_vm5, %v451_v20, %v453_v46  ;;  %v455_v10 = vsel %vm129_vm5, %v449_v2, %v451_v20  ;;  %v433_v29 = vpop.permute.xlu0 %432 }
 0x20d   :  { %v434_v6 = vsel %vm104_vm6, %v431_v25, %v433_v29  ;;  %v460_v9 = vmul.f32 %v455_v10, %v136_v23  ;;  %v461_v54 = vmul.f32 %v454_v31, %v137_v22  ;;  %v420_v23 = vmul.f32 %v415_v11, %v86_v39  ;;  %v570_v22 = vld [vmem:[%s1403_s3] sm:$0xff]  ;;  %s846_s3 = smov [#allocation9]  }
 0x20e   :  { %v441_v17 = vmul.f32 %v434_v6, %v112_v41  ;;  %s709_s21 = sshll.u32 %s846_s3, 4  ;;  %s710_s21 = int_to_ptr.vmem [resolvable:$true] %s709_s21 }
 0x20f   :  { %669 = vmatpush.msrb.mxu2 %v460_v9  ;;  %689 = vmatpush.msrb.mxu3 %v461_v54 }
 0x211   :  { %670 = vmatpush.msrb.mxu2 %v440_v55  ;;  %690 = vmatpush.msrb.mxu3 %v441_v17  ;;  %v611_v7 = vpop.permute.xlu2 %610 }
 0x213   :  { %v467_v27 = vpop.permute.xlu1 %466  ;;  %671 = vmatpush.msrb.mxu2 %v420_v23 }
 0x214   :  { %v476_v33 = vsel %vm154_vm4, %v467_v27, %v1248_v26  ;;  %v477_v41 = vsel %vm154_vm4, %v473_v13, %v467_v27  ;;  %v413_v59 = vpop.permute.xlu0 %412  ;;  %731 = vmatmul.msk.f32.vlgmr.msrb.gmra.mxu2 %vm318_vm8, %v570_v22 }
 0x215   :  { %v414_v39 = vsel %vm79_vm7, %v411_v32, %v413_v59  ;;  %v478_v56 = vmul.f32 %v477_v41, %v159_v4  ;;  %v479_v44 = vmul.f32 %v476_v33, %v160_v5 }
 0x216   :  { %v421_v26 = vmul.f32 %v414_v39, %v87_v12 }
 0x217   :  { %628 = vmatpush.msrb.mxu0 %v478_v56  ;;  %648 = vmatpush.msrb.mxu1 %v479_v44 }
 0x218   :  { %691 = vmatpush.msrb.mxu3 %v421_v26 }
 0x219   :  { %732 = vmatmul.msk.f32.vlgmr.msrb.gmra.mxu3 %vm318_vm8, %v570_v22  ;;  %629 = vmatpush.msrb.mxu0 %v458_v58 }
 0x21a   :  { %649 = vmatpush.msrb.mxu1 %v459_v21 }
 0x21b   :  { %v407_v4 = vpop.permute.xlu1 %406 }
 0x21c   :  { %v427_v46 = vpop.permute.xlu0 %426  ;;  %v416_v14 = vsel %vm79_vm7, %v407_v4, %v1259_v40  ;;  %v417_v5 = vsel %vm79_vm7, %v413_v59, %v407_v4 }
 0x21d   :  { %v436_v12 = vsel %vm104_vm6, %v427_v46, %v1253_v57  ;;  %v437_v18 = vsel %vm104_vm6, %v433_v29, %v427_v46  ;;  %v418_v40 = vmul.f32 %v417_v5, %v84_v48  ;;  %v419_v47 = vmul.f32 %v416_v14, %v85_v51 }
 0x21e   :  { %v438_v19 = vmul.f32 %v437_v18, %v109_v42  ;;  %v439_v45 = vmul.f32 %v436_v12, %v110_v43 }
 0x220   :  { %630 = vmatpush.msrb.mxu0 %v438_v19  ;;  %650 = vmatpush.msrb.mxu1 %v439_v45 }
 0x222   :  { %631 = vmatpush.msrb.mxu0 %v418_v40  ;;  %651 = vmatpush.msrb.mxu1 %v419_v47 }
 0x223   :  { %729 = vmatmul.msk.f32.vlgmr.msrb.gmra.mxu0 %vm318_vm8, %v570_v22  ;;  %730 = vmatmul.msk.f32.vlgmr.msrb.gmra.mxu1 %vm318_vm8, %v570_v22 }
 0x297   :  { %v673_v57 = vpop.f32.mrf.mxu2 }
 0x298   :  { %v674_v42 = vadd.f32 %v673_v57, %v611_v7 }
 0x29a   :  { %v698_v62 = vmax.f32 %v674_v42, 0.0 }
 0x29c   :  { %703 = vst [vmem:[#allocation9 + $0x10] sm:$0xff] %v698_v62  ;;  %v693_v43 = vpop.f32.mrf.mxu3 }
 0x29d   :  { %v694_v2 = vadd.f32 %v693_v43, %v611_v7 }
 0x29f   :  { %v699_v52 = vmax.f32 %v694_v2, 0.0 }
 0x2a0   :  { %v633_v53 = vpop.f32.mrf.mxu0  ;;  %v653_v49 = vpop.f32.mrf.mxu1 }
 0x2a1   :  { %704 = vst [vmem:[#allocation9 + $0x18] sm:$0xff] %v699_v52  ;;  %v634_v48 = vadd.f32 %v633_v53, %v611_v7  ;;  %v654_v50 = vadd.f32 %v653_v49, %v611_v7 }
 0x2a3   :  { %v696_v51 = vmax.f32 %v634_v48, 0.0  ;;  %v697_v8 = vmax.f32 %v654_v50, 0.0 }
 0x2a5   :  { %700 = vst [vmem:[#allocation9] sm:$0xff] %v696_v51 }
 0x2a6   :  { %701 = vst [vmem:[#allocation9 + $0x8] sm:$0xff] %v697_v8 }
 0x2a7   :  { %717 = dma.vmem_to_hbm [thread:$0]  %s710_s21, 512, %s712_s24, [#allocation6], %s833_s29, %s833_s29, %s834_s30  }
 0x2a8   :  { %830 = dma.done.wait [#allocation6], 512  }
 0x2a9   :  { %831 = vsyncadd [#allocation6], 4294966784 }
 0x2aa   :  { %722 = vsyncpa [#allocation5], 1 }
 0x2ab   :  { %723 = vsyncpa [#allocation8], 1 }
 0x2ac   :  { %724 = vsyncpa [#allocation6], 1 }

</bundles_post_ra>
